<compile_context>
chip_gen: v7x
topology: tpu7x:2x2x1
jax: 0.10.0
libtpu: 0.0.40
codegen_flags: <defaults>
</compile_context>

<pallas_src>
import jax
import jax.numpy as jnp
from jax import lax
from jax.experimental import pallas as pl
from jax.experimental.pallas import tpu as pltpu


def _make_conv_block_kernel(CP, H, W, KH, KW, Nb):
    HW = H * W
    PAD = (KH // 2) * W + (KW // 2)               # max |flat shift| of any tap
    TAPS = [(kh - KH // 2, kw - KW // 2) for kh in range(KH) for kw in range(KW)]
    NT = len(TAPS)

    def kernel(x_ref, masks_ref, w1_ref, b1_ref, w2_ref, b2_ref, out_ref,
               xpad_ref, patch_ref):
        # x_ref    : (Nb, CP, HW)          f32  channel-padded images (pad chans = 0)
        # masks_ref: (NT, HW)              f32  per-tap full (row & col) validity
        # w*_ref   : (CP, NT*CP)           f32  weights, cols ordered (kh, kw, ci)
        # b*_ref   : (CP, 1)               f32  bias (pad rows = 0)
        # out_ref  : (Nb, CP, HW)          f32
        # xpad_ref : (Nb, CP, HW + 2*PAD)  f32  lane-padded activation scratch
        # patch_ref: (NT*CP, Nb*HW)        f32  im2col slab (full-tile stores)

        # Zero the PAD border lanes once per step: the per-tap masks already
        # kill every out-of-image contribution, this just guarantees the masked
        # multiplies never see NaN/Inf garbage from uninitialized VMEM.
        zb = jnp.zeros((Nb, CP, PAD), jnp.float32)
        xpad_ref[:, :, :PAD] = zb
        xpad_ref[:, :, PAD + HW:] = zb

        def conv_relu(acts, w_ref, b_ref):
            # acts: list of Nb (CP, HW) f32 slabs -> list of Nb (CP, HW) f32 slabs
            for n in range(Nb):
                xpad_ref[n, :, PAD:PAD + HW] = acts[n]
                for t, (dy, dx) in enumerate(TAPS):
                    start = PAD + dy * W + dx
                    tap = xpad_ref[n, :, start:start + HW]        # (CP, HW)
                    if not (dy == 0 and dx == 0):
                        tap = tap * masks_ref[t:t + 1, :]         # zero invalid taps
                    # Full (8,128)-tile aligned, unmasked store (CP = 8, HW mult of 128).
                    patch_ref[t * CP:(t + 1) * CP, n * HW:(n + 1) * HW] = tap
            # One MXU matmul per conv over all Nb fused images.
            acc = jnp.dot(w_ref[...], patch_ref[...],
                          preferred_element_type=jnp.float32)     # (CP, Nb*HW)
            acc = jnp.maximum(acc + b_ref[...], 0.0)              # bias + ReLU (f32 VPU)
            # Per-image lane slices at multiples of HW=256 -> 128-aligned.
            return [acc[:, n * HW:(n + 1) * HW] for n in range(Nb)]

        xs = [x_ref[n] for n in range(Nb)]
        mids = conv_relu(xs, w1_ref, b1_ref)
        outs = conv_relu(mids, w2_ref, b2_ref)
        for n in range(Nb):
            out_ref[n] = (outs[n] + xs[n]).astype(out_ref.dtype)  # residual add

    return kernel


def conv_block_pallas(x_nchw, w1_oihw, b1, w2_oihw, b2, *, grid_steps=None):
    """x_nchw: (N, C, H, W) f32; weights in PyTorch OIHW. Returns (N, C, H, W) f32."""
    N, C, H, W = x_nchw.shape
    Cout, Cin, KH, KW = w1_oihw.shape
    assert Cin == C and Cout == C, "residual add needs in_channels == out_channels"
    assert KH == KW == 3, "module uses padding=1; shape-preserving only for 3x3"
    HW = H * W
    PAD = (KH // 2) * W + (KW // 2)
    NT = KH * KW

    # Keep 2 "parallel" grid steps when possible (feeds both TCs on v7x); all
    # remaining batch parallelism goes into the matmul lane dimension (Nb/step).
    if grid_steps is None:
        grid_steps = 2 if (N % 2 == 0 and N >= 2) else 1
    assert N % grid_steps == 0, "batch must divide evenly over grid steps"
    Nb = N // grid_steps

    # Pad channels 4 -> 8 so every patch/tap block is a full (8,128) f32 tile.
    CP = max(8, ((C + 7) // 8) * 8)

    # Boundary glue: reshape + zero channel-pad only (no transposes of activations).
    x_flat = x_nchw.reshape(N, C, HW).astype(jnp.float32)
    x_pad = jnp.pad(x_flat, ((0, 0), (0, CP - C), (0, 0)))         # (N, CP, HW)

    def w_to_mat(w):
        # OIHW -> (CP, KH*KW*CP), cols ordered (kh, kw, ci); zero pad rows/cols.
        w_p = jnp.pad(w.astype(jnp.float32),
                      ((0, CP - C), (0, CP - C), (0, 0), (0, 0)))  # (CP, CP, KH, KW)
        return jnp.transpose(w_p, (0, 2, 3, 1)).reshape(CP, KH * KW * CP)

    w1m, w2m = w_to_mat(w1_oihw), w_to_mat(w2_oihw)
    b1p = jnp.pad(b1.astype(jnp.float32), (0, CP - C)).reshape(CP, 1)
    b2p = jnp.pad(b2.astype(jnp.float32), (0, CP - C)).reshape(CP, 1)

    # Compile-time per-tap validity masks: 1 iff (y+dy, x+dx) lies inside the image.
    yy = jnp.arange(HW, dtype=jnp.int32) // W
    xx = jnp.arange(HW, dtype=jnp.int32) % W
    taps = [(kh - KH // 2, kw - KW // 2) for kh in range(KH) for kw in range(KW)]
    masks = jnp.stack([((yy + dy >= 0) & (yy + dy < H) &
                        (xx + dx >= 0) & (xx + dx < W)).astype(jnp.float32)
                       for dy, dx in taps])                        # (NT, HW)

    kernel = _make_conv_block_kernel(CP, H, W, KH, KW, Nb)

    out_flat = pl.pallas_call(
        kernel,
        out_shape=jax.ShapeDtypeStruct((N, CP, HW), jnp.float32),
        grid=(grid_steps,),
        in_specs=[
            pl.BlockSpec((Nb, CP, HW), lambda g: (g, 0, 0)),       # Nb fused images
            pl.BlockSpec((NT, HW), lambda g: (0, 0)),              # tap masks (const)
            pl.BlockSpec((CP, NT * CP), lambda g: (0, 0)),         # w1
            pl.BlockSpec((CP, 1), lambda g: (0, 0)),               # b1
            pl.BlockSpec((CP, NT * CP), lambda g: (0, 0)),         # w2
            pl.BlockSpec((CP, 1), lambda g: (0, 0)),               # b2
        ],
        out_specs=pl.BlockSpec((Nb, CP, HW), lambda g: (g, 0, 0)), # lane+sublane dense
        scratch_shapes=[
            pltpu.VMEM((Nb, CP, HW + 2 * PAD), jnp.float32),       # lane-padded acts
            pltpu.VMEM((NT * CP, Nb * HW), jnp.float32),           # im2col slab
        ],
        compiler_params=pltpu.CompilerParams(
            dimension_semantics=("parallel",)),                    # batch across TCs (v7x)
    )(x_pad, masks, w1m, b1p, w2m, b2p)

    return out_flat[:, :C, :].reshape(N, C, H, W)


def conv_block_reference(x, w1, b1, w2, b2):
    dn = ("NCHW", "OIHW", "NCHW")
    pad = ((1, 1), (1, 1))
    o = lax.conv_general_dilated(x, w1, (1, 1), pad, dimension_numbers=dn)
    o = jnp.maximum(o + b1[None, :, None, None], 0.0)
    o = lax.conv_general_dilated(o, w2, (1, 1), pad, dimension_numbers=dn)
    o = jnp.maximum(o + b2[None, :, None, None], 0.0)
    return o + x


if __name__ == "__main__":
    # ConvBlock_DDP(in_channels=4, out_channels=4, conv_size=3): residual add
    # requires in_channels == out_channels; padding=1, stride=1 keeps H, W.
    N, C, H, W = 2, 4, 16, 16
    KH = KW = 3

    key = jax.random.PRNGKey(0)
    kx, k1, k2, k3, k4 = jax.random.split(key, 5)
    x = jax.random.normal(kx, (N, C, H, W), jnp.float32)

    # PyTorch-style init: U(-1/sqrt(fan_in), 1/sqrt(fan_in))
    fan_in = C * KH * KW
    bound = 1.0 / (fan_in ** 0.5)
    w1 = jax.random.uniform(k1, (C, C, KH, KW), jnp.float32, -bound, bound)
    b1 = jax.random.uniform(k2, (C,), jnp.float32, -bound, bound)
    w2 = jax.random.uniform(k3, (C, C, KH, KW), jnp.float32, -bound, bound)
    b2 = jax.random.uniform(k4, (C,), jnp.float32, -bound, bound)

    out = jax.block_until_ready(conv_block_pallas(x, w1, b1, w2, b2))
    ref = jax.block_until_ready(conv_block_reference(x, w1, b1, w2, b2))

    assert out.shape == (N, C, H, W)
    max_err = jnp.max(jnp.abs(out - ref))
    assert jnp.allclose(out, ref, atol=2e-2, rtol=2e-2), f"max err {max_err}"
    print("KERNEL_OK")
</pallas_src>

<mosaic_0001>
module attributes {stable_mosaic.version = 11 : i64} {
  func.func @kernel(%arg0: i32, %arg1: memref<1x8x256xf32, #tpu.memory_space<vmem>>, %arg2: memref<9x256xf32, #tpu.memory_space<vmem>>, %arg3: memref<8x72xf32, #tpu.memory_space<vmem>>, %arg4: memref<8x1xf32, #tpu.memory_space<vmem>>, %arg5: memref<8x72xf32, #tpu.memory_space<vmem>>, %arg6: memref<8x1xf32, #tpu.memory_space<vmem>>, %arg7: memref<1x8x256xf32, #tpu.memory_space<vmem>>, %arg8: memref<1x8x290xf32, #tpu.memory_space<vmem>>, %arg9: memref<72x256xf32, #tpu.memory_space<vmem>>) attributes {dimension_semantics = [#tpu.dimension_semantics<parallel>], iteration_bounds = array<i64: 2>, scalar_prefetch = 0 : i64, scratch_operands = 2 : i64, tpu.core_type = #tpu.core_type<tc>, window_params = [{transform_indices = @transform_0, window_bounds = array<i64: 1, 8, 256>}, {pipeline_mode = #tpu.pipeline_mode<synchronous>, transform_indices = @transform_1, window_bounds = array<i64: 9, 256>}, {pipeline_mode = #tpu.pipeline_mode<synchronous>, transform_indices = @transform_2, window_bounds = array<i64: 8, 72>}, {pipeline_mode = #tpu.pipeline_mode<synchronous>, transform_indices = @transform_3, window_bounds = array<i64: 8, 1>}, {pipeline_mode = #tpu.pipeline_mode<synchronous>, transform_indices = @transform_4, window_bounds = array<i64: 8, 72>}, {pipeline_mode = #tpu.pipeline_mode<synchronous>, transform_indices = @transform_5, window_bounds = array<i64: 8, 1>}, {transform_indices = @transform_6, window_bounds = array<i64: 1, 8, 256>}]} {
    %cst = arith.constant 0.000000e+00 : f32
    %0 = vector.broadcast %cst : f32 to vector<1x8x17xf32>
    %c0 = arith.constant 0 : index
    %c0_0 = arith.constant 0 : index
    %c0_1 = arith.constant 0 : index
    %1 = vector.load %arg8[%c0, %c0_0, %c0_1] : memref<1x8x290xf32, #tpu.memory_space<vmem>>, vector<1x8x17xf32>
    tpu.vector_store %arg8[%c0, %c0_0, %c0_1], %0 {strides = array<i32>} : memref<1x8x290xf32, #tpu.memory_space<vmem>>, vector<1x8x17xf32>,
    %c0_2 = arith.constant 0 : index
    %c0_3 = arith.constant 0 : index
    %c273 = arith.constant 273 : index
    %2 = vector.load %arg8[%c0_2, %c0_3, %c273] : memref<1x8x290xf32, #tpu.memory_space<vmem>>, vector<1x8x17xf32>
    tpu.vector_store %arg8[%c0_2, %c0_3, %c273], %0 {strides = array<i32>} : memref<1x8x290xf32, #tpu.memory_space<vmem>>, vector<1x8x17xf32>,
    %c0_4 = arith.constant 0 : index
    %c0_5 = arith.constant 0 : index
    %c0_6 = arith.constant 0 : index
    %3 = vector.load %arg1[%c0_4, %c0_5, %c0_6] : memref<1x8x256xf32, #tpu.memory_space<vmem>>, vector<1x8x256xf32>
    %4 = vector.shape_cast %3 : vector<1x8x256xf32> to vector<8x256xf32>
    %c0_7 = arith.constant 0 : index
    %c0_8 = arith.constant 0 : index
    %c17 = arith.constant 17 : index
    %5 = vector.load %arg8[%c0_7, %c0_8, %c17] : memref<1x8x290xf32, #tpu.memory_space<vmem>>, vector<1x8x256xf32>
    %6 = vector.shape_cast %5 : vector<1x8x256xf32> to vector<8x256xf32>
    %7 = vector.shape_cast %4 : vector<8x256xf32> to vector<1x8x256xf32>
    tpu.vector_store %arg8[%c0_7, %c0_8, %c17], %7 {strides = array<i32>} : memref<1x8x290xf32, #tpu.memory_space<vmem>>, vector<1x8x256xf32>,
    %c0_9 = arith.constant 0 : index
    %c0_10 = arith.constant 0 : index
    %c0_11 = arith.constant 0 : index
    %8 = vector.load %arg8[%c0_9, %c0_10, %c0_11] : memref<1x8x290xf32, #tpu.memory_space<vmem>>, vector<1x8x256xf32>
    %9 = vector.shape_cast %8 : vector<1x8x256xf32> to vector<8x256xf32>
    %c0_12 = arith.constant 0 : index
    %c0_13 = arith.constant 0 : index
    %10 = vector.load %arg2[%c0_12, %c0_13] : memref<9x256xf32, #tpu.memory_space<vmem>>, vector<1x256xf32>
    %11 = vector.broadcast %10 : vector<1x256xf32> to vector<8x256xf32>
    %12 = arith.mulf %9, %11 : vector<8x256xf32>
    %c0_14 = arith.constant 0 : index
    %c0_15 = arith.constant 0 : index
    %13 = vector.load %arg9[%c0_14, %c0_15] : memref<72x256xf32, #tpu.memory_space<vmem>>, vector<8x256xf32>
    tpu.vector_store %arg9[%c0_14, %c0_15], %12 {strides = array<i32>} : memref<72x256xf32, #tpu.memory_space<vmem>>, vector<8x256xf32>,
    %c0_16 = arith.constant 0 : index
    %c0_17 = arith.constant 0 : index
    %c1 = arith.constant 1 : index
    %14 = vector.load %arg8[%c0_16, %c0_17, %c1] : memref<1x8x290xf32, #tpu.memory_space<vmem>>, vector<1x8x256xf32>
    %15 = vector.shape_cast %14 : vector<1x8x256xf32> to vector<8x256xf32>
    %c1_18 = arith.constant 1 : index
    %c0_19 = arith.constant 0 : index
    %16 = vector.load %arg2[%c1_18, %c0_19] : memref<9x256xf32, #tpu.memory_space<vmem>>, vector<1x256xf32>
    %17 = vector.broadcast %16 : vector<1x256xf32> to vector<8x256xf32>
    %18 = arith.mulf %15, %17 : vector<8x256xf32>
    %c8 = arith.constant 8 : index
    %c0_20 = arith.constant 0 : index
    %19 = vector.load %arg9[%c8, %c0_20] : memref<72x256xf32, #tpu.memory_space<vmem>>, vector<8x256xf32>
    tpu.vector_store %arg9[%c8, %c0_20], %18 {strides = array<i32>} : memref<72x256xf32, #tpu.memory_space<vmem>>, vector<8x256xf32>,
    %c0_21 = arith.constant 0 : index
    %c0_22 = arith.constant 0 : index
    %c2 = arith.constant 2 : index
    %20 = vector.load %arg8[%c0_21, %c0_22, %c2] : memref<1x8x290xf32, #tpu.memory_space<vmem>>, vector<1x8x256xf32>
    %21 = vector.shape_cast %20 : vector<1x8x256xf32> to vector<8x256xf32>
    %c2_23 = arith.constant 2 : index
    %c0_24 = arith.constant 0 : index
    %22 = vector.load %arg2[%c2_23, %c0_24] : memref<9x256xf32, #tpu.memory_space<vmem>>, vector<1x256xf32>
    %23 = vector.broadcast %22 : vector<1x256xf32> to vector<8x256xf32>
    %24 = arith.mulf %21, %23 : vector<8x256xf32>
    %c16 = arith.constant 16 : index
    %c0_25 = arith.constant 0 : index
    %25 = vector.load %arg9[%c16, %c0_25] : memref<72x256xf32, #tpu.memory_space<vmem>>, vector<8x256xf32>
    tpu.vector_store %arg9[%c16, %c0_25], %24 {strides = array<i32>} : memref<72x256xf32, #tpu.memory_space<vmem>>, vector<8x256xf32>,
    %c0_26 = arith.constant 0 : index
    %c0_27 = arith.constant 0 : index
    %c16_28 = arith.constant 16 : index
    %26 = vector.load %arg8[%c0_26, %c0_27, %c16_28] : memref<1x8x290xf32, #tpu.memory_space<vmem>>, vector<1x8x256xf32>
    %27 = vector.shape_cast %26 : vector<1x8x256xf32> to vector<8x256xf32>
    %c3 = arith.constant 3 : index
    %c0_29 = arith.constant 0 : index
    %28 = vector.load %arg2[%c3, %c0_29] : memref<9x256xf32, #tpu.memory_space<vmem>>, vector<1x256xf32>
    %29 = vector.broadcast %28 : vector<1x256xf32> to vector<8x256xf32>
    %30 = arith.mulf %27, %29 : vector<8x256xf32>
    %c24 = arith.constant 24 : index
    %c0_30 = arith.constant 0 : index
    %31 = vector.load %arg9[%c24, %c0_30] : memref<72x256xf32, #tpu.memory_space<vmem>>, vector<8x256xf32>
    tpu.vector_store %arg9[%c24, %c0_30], %30 {strides = array<i32>} : memref<72x256xf32, #tpu.memory_space<vmem>>, vector<8x256xf32>,
    %c0_31 = arith.constant 0 : index
    %c0_32 = arith.constant 0 : index
    %c17_33 = arith.constant 17 : index
    %32 = vector.load %arg8[%c0_31, %c0_32, %c17_33] : memref<1x8x290xf32, #tpu.memory_space<vmem>>, vector<1x8x256xf32>
    %33 = vector.shape_cast %32 : vector<1x8x256xf32> to vector<8x256xf32>
    %c32 = arith.constant 32 : index
    %c0_34 = arith.constant 0 : index
    %34 = vector.load %arg9[%c32, %c0_34] : memref<72x256xf32, #tpu.memory_space<vmem>>, vector<8x256xf32>
    tpu.vector_store %arg9[%c32, %c0_34], %33 {strides = array<i32>} : memref<72x256xf32, #tpu.memory_space<vmem>>, vector<8x256xf32>,
    %c0_35 = arith.constant 0 : index
    %c0_36 = arith.constant 0 : index
    %c18 = arith.constant 18 : index
    %35 = vector.load %arg8[%c0_35, %c0_36, %c18] : memref<1x8x290xf32, #tpu.memory_space<vmem>>, vector<1x8x256xf32>
    %36 = vector.shape_cast %35 : vector<1x8x256xf32> to vector<8x256xf32>
    %c5 = arith.constant 5 : index
    %c0_37 = arith.constant 0 : index
    %37 = vector.load %arg2[%c5, %c0_37] : memref<9x256xf32, #tpu.memory_space<vmem>>, vector<1x256xf32>
    %38 = vector.broadcast %37 : vector<1x256xf32> to vector<8x256xf32>
    %39 = arith.mulf %36, %38 : vector<8x256xf32>
    %c40 = arith.constant 40 : index
    %c0_38 = arith.constant 0 : index
    %40 = vector.load %arg9[%c40, %c0_38] : memref<72x256xf32, #tpu.memory_space<vmem>>, vector<8x256xf32>
    tpu.vector_store %arg9[%c40, %c0_38], %39 {strides = array<i32>} : memref<72x256xf32, #tpu.memory_space<vmem>>, vector<8x256xf32>,
    %c0_39 = arith.constant 0 : index
    %c0_40 = arith.constant 0 : index
    %c32_41 = arith.constant 32 : index
    %41 = vector.load %arg8[%c0_39, %c0_40, %c32_41] : memref<1x8x290xf32, #tpu.memory_space<vmem>>, vector<1x8x256xf32>
    %42 = vector.shape_cast %41 : vector<1x8x256xf32> to vector<8x256xf32>
    %c6 = arith.constant 6 : index
    %c0_42 = arith.constant 0 : index
    %43 = vector.load %arg2[%c6, %c0_42] : memref<9x256xf32, #tpu.memory_space<vmem>>, vector<1x256xf32>
    %44 = vector.broadcast %43 : vector<1x256xf32> to vector<8x256xf32>
    %45 = arith.mulf %42, %44 : vector<8x256xf32>
    %c48 = arith.constant 48 : index
    %c0_43 = arith.constant 0 : index
    %46 = vector.load %arg9[%c48, %c0_43] : memref<72x256xf32, #tpu.memory_space<vmem>>, vector<8x256xf32>
    tpu.vector_store %arg9[%c48, %c0_43], %45 {strides = array<i32>} : memref<72x256xf32, #tpu.memory_space<vmem>>, vector<8x256xf32>,
    %c0_44 = arith.constant 0 : index
    %c0_45 = arith.constant 0 : index
    %c33 = arith.constant 33 : index
    %47 = vector.load %arg8[%c0_44, %c0_45, %c33] : memref<1x8x290xf32, #tpu.memory_space<vmem>>, vector<1x8x256xf32>
    %48 = vector.shape_cast %47 : vector<1x8x256xf32> to vector<8x256xf32>
    %c7 = arith.constant 7 : index
    %c0_46 = arith.constant 0 : index
    %49 = vector.load %arg2[%c7, %c0_46] : memref<9x256xf32, #tpu.memory_space<vmem>>, vector<1x256xf32>
    %50 = vector.broadcast %49 : vector<1x256xf32> to vector<8x256xf32>
    %51 = arith.mulf %48, %50 : vector<8x256xf32>
    %c56 = arith.constant 56 : index
    %c0_47 = arith.constant 0 : index
    %52 = vector.load %arg9[%c56, %c0_47] : memref<72x256xf32, #tpu.memory_space<vmem>>, vector<8x256xf32>
    tpu.vector_store %arg9[%c56, %c0_47], %51 {strides = array<i32>} : memref<72x256xf32, #tpu.memory_space<vmem>>, vector<8x256xf32>,
    %c0_48 = arith.constant 0 : index
    %c0_49 = arith.constant 0 : index
    %c34 = arith.constant 34 : index
    %53 = vector.load %arg8[%c0_48, %c0_49, %c34] : memref<1x8x290xf32, #tpu.memory_space<vmem>>, vector<1x8x256xf32>
    %54 = vector.shape_cast %53 : vector<1x8x256xf32> to vector<8x256xf32>
    %c8_50 = arith.constant 8 : index
    %c0_51 = arith.constant 0 : index
    %55 = vector.load %arg2[%c8_50, %c0_51] : memref<9x256xf32, #tpu.memory_space<vmem>>, vector<1x256xf32>
    %56 = vector.broadcast %55 : vector<1x256xf32> to vector<8x256xf32>
    %57 = arith.mulf %54, %56 : vector<8x256xf32>
    %c64 = arith.constant 64 : index
    %c0_52 = arith.constant 0 : index
    %58 = vector.load %arg9[%c64, %c0_52] : memref<72x256xf32, #tpu.memory_space<vmem>>, vector<8x256xf32>
    tpu.vector_store %arg9[%c64, %c0_52], %57 {strides = array<i32>} : memref<72x256xf32, #tpu.memory_space<vmem>>, vector<8x256xf32>,
    %c0_53 = arith.constant 0 : index
    %c0_54 = arith.constant 0 : index
    %59 = vector.load %arg3[%c0_53, %c0_54] : memref<8x72xf32, #tpu.memory_space<vmem>>, vector<8x72xf32>
    %c0_55 = arith.constant 0 : index
    %c0_56 = arith.constant 0 : index
    %60 = vector.load %arg9[%c0_55, %c0_56] : memref<72x256xf32, #tpu.memory_space<vmem>>, vector<72x256xf32>
    %cst_57 = arith.constant dense<0.000000e+00> : vector<8x256xf32>
    %61 = tpu.matmul %59, %60, %cst_57 {dimension_numbers = #tpu.dot_dimension_numbers<[1], [0], [0], [1], [0, 0, 1, 1], [], []>} : vector<8x72xf32>, vector<72x256xf32>, vector<8x256xf32> -> vector<8x256xf32>
    %c0_58 = arith.constant 0 : index
    %c0_59 = arith.constant 0 : index
    %62 = vector.load %arg4[%c0_58, %c0_59] : memref<8x1xf32, #tpu.memory_space<vmem>>, vector<8x1xf32>
    %63 = vector.broadcast %62 : vector<8x1xf32> to vector<8x256xf32>
    %64 = arith.addf %61, %63 : vector<8x256xf32>
    %cst_60 = arith.constant 0.000000e+00 : f32
    %65 = vector.broadcast %cst_60 : f32 to vector<8x256xf32>
    %66 = arith.maximumf %64, %65 : vector<8x256xf32>
    %c0_61 = arith.constant 0 : index
    %c0_62 = arith.constant 0 : index
    %c17_63 = arith.constant 17 : index
    %67 = vector.load %arg8[%c0_61, %c0_62, %c17_63] : memref<1x8x290xf32, #tpu.memory_space<vmem>>, vector<1x8x256xf32>
    %68 = vector.shape_cast %67 : vector<1x8x256xf32> to vector<8x256xf32>
    %69 = vector.shape_cast %66 : vector<8x256xf32> to vector<1x8x256xf32>
    tpu.vector_store %arg8[%c0_61, %c0_62, %c17_63], %69 {strides = array<i32>} : memref<1x8x290xf32, #tpu.memory_space<vmem>>, vector<1x8x256xf32>,
    %c0_64 = arith.constant 0 : index
    %c0_65 = arith.constant 0 : index
    %c0_66 = arith.constant 0 : index
    %70 = vector.load %arg8[%c0_64, %c0_65, %c0_66] : memref<1x8x290xf32, #tpu.memory_space<vmem>>, vector<1x8x256xf32>
    %71 = vector.shape_cast %70 : vector<1x8x256xf32> to vector<8x256xf32>
    %c0_67 = arith.constant 0 : index
    %c0_68 = arith.constant 0 : index
    %72 = vector.load %arg2[%c0_67, %c0_68] : memref<9x256xf32, #tpu.memory_space<vmem>>, vector<1x256xf32>
    %73 = vector.broadcast %72 : vector<1x256xf32> to vector<8x256xf32>
    %74 = arith.mulf %71, %73 : vector<8x256xf32>
    %c0_69 = arith.constant 0 : index
    %c0_70 = arith.constant 0 : index
    %75 = vector.load %arg9[%c0_69, %c0_70] : memref<72x256xf32, #tpu.memory_space<vmem>>, vector<8x256xf32>
    tpu.vector_store %arg9[%c0_69, %c0_70], %74 {strides = array<i32>} : memref<72x256xf32, #tpu.memory_space<vmem>>, vector<8x256xf32>,
    %c0_71 = arith.constant 0 : index
    %c0_72 = arith.constant 0 : index
    %c1_73 = arith.constant 1 : index
    %76 = vector.load %arg8[%c0_71, %c0_72, %c1_73] : memref<1x8x290xf32, #tpu.memory_space<vmem>>, vector<1x8x256xf32>
    %77 = vector.shape_cast %76 : vector<1x8x256xf32> to vector<8x256xf32>
    %c1_74 = arith.constant 1 : index
    %c0_75 = arith.constant 0 : index
    %78 = vector.load %arg2[%c1_74, %c0_75] : memref<9x256xf32, #tpu.memory_space<vmem>>, vector<1x256xf32>
    %79 = vector.broadcast %78 : vector<1x256xf32> to vector<8x256xf32>
    %80 = arith.mulf %77, %79 : vector<8x256xf32>
    %c8_76 = arith.constant 8 : index
    %c0_77 = arith.constant 0 : index
    %81 = vector.load %arg9[%c8_76, %c0_77] : memref<72x256xf32, #tpu.memory_space<vmem>>, vector<8x256xf32>
    tpu.vector_store %arg9[%c8_76, %c0_77], %80 {strides = array<i32>} : memref<72x256xf32, #tpu.memory_space<vmem>>, vector<8x256xf32>,
    %c0_78 = arith.constant 0 : index
    %c0_79 = arith.constant 0 : index
    %c2_80 = arith.constant 2 : index
    %82 = vector.load %arg8[%c0_78, %c0_79, %c2_80] : memref<1x8x290xf32, #tpu.memory_space<vmem>>, vector<1x8x256xf32>
    %83 = vector.shape_cast %82 : vector<1x8x256xf32> to vector<8x256xf32>
    %c2_81 = arith.constant 2 : index
    %c0_82 = arith.constant 0 : index
    %84 = vector.load %arg2[%c2_81, %c0_82] : memref<9x256xf32, #tpu.memory_space<vmem>>, vector<1x256xf32>
    %85 = vector.broadcast %84 : vector<1x256xf32> to vector<8x256xf32>
    %86 = arith.mulf %83, %85 : vector<8x256xf32>
    %c16_83 = arith.constant 16 : index
    %c0_84 = arith.constant 0 : index
    %87 = vector.load %arg9[%c16_83, %c0_84] : memref<72x256xf32, #tpu.memory_space<vmem>>, vector<8x256xf32>
    tpu.vector_store %arg9[%c16_83, %c0_84], %86 {strides = array<i32>} : memref<72x256xf32, #tpu.memory_space<vmem>>, vector<8x256xf32>,
    %c0_85 = arith.constant 0 : index
    %c0_86 = arith.constant 0 : index
    %c16_87 = arith.constant 16 : index
    %88 = vector.load %arg8[%c0_85, %c0_86, %c16_87] : memref<1x8x290xf32, #tpu.memory_space<vmem>>, vector<1x8x256xf32>
    %89 = vector.shape_cast %88 : vector<1x8x256xf32> to vector<8x256xf32>
    %c3_88 = arith.constant 3 : index
    %c0_89 = arith.constant 0 : index
    %90 = vector.load %arg2[%c3_88, %c0_89] : memref<9x256xf32, #tpu.memory_space<vmem>>, vector<1x256xf32>
    %91 = vector.broadcast %90 : vector<1x256xf32> to vector<8x256xf32>
    %92 = arith.mulf %89, %91 : vector<8x256xf32>
    %c24_90 = arith.constant 24 : index
    %c0_91 = arith.constant 0 : index
    %93 = vector.load %arg9[%c24_90, %c0_91] : memref<72x256xf32, #tpu.memory_space<vmem>>, vector<8x256xf32>
    tpu.vector_store %arg9[%c24_90, %c0_91], %92 {strides = array<i32>} : memref<72x256xf32, #tpu.memory_space<vmem>>, vector<8x256xf32>,
    %c0_92 = arith.constant 0 : index
    %c0_93 = arith.constant 0 : index
    %c17_94 = arith.constant 17 : index
    %94 = vector.load %arg8[%c0_92, %c0_93, %c17_94] : memref<1x8x290xf32, #tpu.memory_space<vmem>>, vector<1x8x256xf32>
    %95 = vector.shape_cast %94 : vector<1x8x256xf32> to vector<8x256xf32>
    %c32_95 = arith.constant 32 : index
    %c0_96 = arith.constant 0 : index
    %96 = vector.load %arg9[%c32_95, %c0_96] : memref<72x256xf32, #tpu.memory_space<vmem>>, vector<8x256xf32>
    tpu.vector_store %arg9[%c32_95, %c0_96], %95 {strides = array<i32>} : memref<72x256xf32, #tpu.memory_space<vmem>>, vector<8x256xf32>,
    %c0_97 = arith.constant 0 : index
    %c0_98 = arith.constant 0 : index
    %c18_99 = arith.constant 18 : index
    %97 = vector.load %arg8[%c0_97, %c0_98, %c18_99] : memref<1x8x290xf32, #tpu.memory_space<vmem>>, vector<1x8x256xf32>
    %98 = vector.shape_cast %97 : vector<1x8x256xf32> to vector<8x256xf32>
    %c5_100 = arith.constant 5 : index
    %c0_101 = arith.constant 0 : index
    %99 = vector.load %arg2[%c5_100, %c0_101] : memref<9x256xf32, #tpu.memory_space<vmem>>, vector<1x256xf32>
    %100 = vector.broadcast %99 : vector<1x256xf32> to vector<8x256xf32>
    %101 = arith.mulf %98, %100 : vector<8x256xf32>
    %c40_102 = arith.constant 40 : index
    %c0_103 = arith.constant 0 : index
    %102 = vector.load %arg9[%c40_102, %c0_103] : memref<72x256xf32, #tpu.memory_space<vmem>>, vector<8x256xf32>
    tpu.vector_store %arg9[%c40_102, %c0_103], %101 {strides = array<i32>} : memref<72x256xf32, #tpu.memory_space<vmem>>, vector<8x256xf32>,
    %c0_104 = arith.constant 0 : index
    %c0_105 = arith.constant 0 : index
    %c32_106 = arith.constant 32 : index
    %103 = vector.load %arg8[%c0_104, %c0_105, %c32_106] : memref<1x8x290xf32, #tpu.memory_space<vmem>>, vector<1x8x256xf32>
    %104 = vector.shape_cast %103 : vector<1x8x256xf32> to vector<8x256xf32>
    %c6_107 = arith.constant 6 : index
    %c0_108 = arith.constant 0 : index
    %105 = vector.load %arg2[%c6_107, %c0_108] : memref<9x256xf32, #tpu.memory_space<vmem>>, vector<1x256xf32>
    %106 = vector.broadcast %105 : vector<1x256xf32> to vector<8x256xf32>
    %107 = arith.mulf %104, %106 : vector<8x256xf32>
    %c48_109 = arith.constant 48 : index
    %c0_110 = arith.constant 0 : index
    %108 = vector.load %arg9[%c48_109, %c0_110] : memref<72x256xf32, #tpu.memory_space<vmem>>, vector<8x256xf32>
    tpu.vector_store %arg9[%c48_109, %c0_110], %107 {strides = array<i32>} : memref<72x256xf32, #tpu.memory_space<vmem>>, vector<8x256xf32>,
    %c0_111 = arith.constant 0 : index
    %c0_112 = arith.constant 0 : index
    %c33_113 = arith.constant 33 : index
    %109 = vector.load %arg8[%c0_111, %c0_112, %c33_113] : memref<1x8x290xf32, #tpu.memory_space<vmem>>, vector<1x8x256xf32>
    %110 = vector.shape_cast %109 : vector<1x8x256xf32> to vector<8x256xf32>
    %c7_114 = arith.constant 7 : index
    %c0_115 = arith.constant 0 : index
    %111 = vector.load %arg2[%c7_114, %c0_115] : memref<9x256xf32, #tpu.memory_space<vmem>>, vector<1x256xf32>
    %112 = vector.broadcast %111 : vector<1x256xf32> to vector<8x256xf32>
    %113 = arith.mulf %110, %112 : vector<8x256xf32>
    %c56_116 = arith.constant 56 : index
    %c0_117 = arith.constant 0 : index
    %114 = vector.load %arg9[%c56_116, %c0_117] : memref<72x256xf32, #tpu.memory_space<vmem>>, vector<8x256xf32>
    tpu.vector_store %arg9[%c56_116, %c0_117], %113 {strides = array<i32>} : memref<72x256xf32, #tpu.memory_space<vmem>>, vector<8x256xf32>,
    %c0_118 = arith.constant 0 : index
    %c0_119 = arith.constant 0 : index
    %c34_120 = arith.constant 34 : index
    %115 = vector.load %arg8[%c0_118, %c0_119, %c34_120] : memref<1x8x290xf32, #tpu.memory_space<vmem>>, vector<1x8x256xf32>
    %116 = vector.shape_cast %115 : vector<1x8x256xf32> to vector<8x256xf32>
    %c8_121 = arith.constant 8 : index
    %c0_122 = arith.constant 0 : index
    %117 = vector.load %arg2[%c8_121, %c0_122] : memref<9x256xf32, #tpu.memory_space<vmem>>, vector<1x256xf32>
    %118 = vector.broadcast %117 : vector<1x256xf32> to vector<8x256xf32>
    %119 = arith.mulf %116, %118 : vector<8x256xf32>
    %c64_123 = arith.constant 64 : index
    %c0_124 = arith.constant 0 : index
    %120 = vector.load %arg9[%c64_123, %c0_124] : memref<72x256xf32, #tpu.memory_space<vmem>>, vector<8x256xf32>
    tpu.vector_store %arg9[%c64_123, %c0_124], %119 {strides = array<i32>} : memref<72x256xf32, #tpu.memory_space<vmem>>, vector<8x256xf32>,
    %c0_125 = arith.constant 0 : index
    %c0_126 = arith.constant 0 : index
    %121 = vector.load %arg5[%c0_125, %c0_126] : memref<8x72xf32, #tpu.memory_space<vmem>>, vector<8x72xf32>
    %c0_127 = arith.constant 0 : index
    %c0_128 = arith.constant 0 : index
    %122 = vector.load %arg9[%c0_127, %c0_128] : memref<72x256xf32, #tpu.memory_space<vmem>>, vector<72x256xf32>
    %cst_129 = arith.constant dense<0.000000e+00> : vector<8x256xf32>
    %123 = tpu.matmul %121, %122, %cst_129 {dimension_numbers = #tpu.dot_dimension_numbers<[1], [0], [0], [1], [0, 0, 1, 1], [], []>} : vector<8x72xf32>, vector<72x256xf32>, vector<8x256xf32> -> vector<8x256xf32>
    %c0_130 = arith.constant 0 : index
    %c0_131 = arith.constant 0 : index
    %124 = vector.load %arg6[%c0_130, %c0_131] : memref<8x1xf32, #tpu.memory_space<vmem>>, vector<8x1xf32>
    %125 = vector.broadcast %124 : vector<8x1xf32> to vector<8x256xf32>
    %126 = arith.addf %123, %125 : vector<8x256xf32>
    %cst_132 = arith.constant 0.000000e+00 : f32
    %127 = vector.broadcast %cst_132 : f32 to vector<8x256xf32>
    %128 = arith.maximumf %126, %127 : vector<8x256xf32>
    %129 = arith.addf %128, %4 : vector<8x256xf32>
    %c0_133 = arith.constant 0 : index
    %c0_134 = arith.constant 0 : index
    %c0_135 = arith.constant 0 : index
    %130 = vector.load %arg7[%c0_133, %c0_134, %c0_135] : memref<1x8x256xf32, #tpu.memory_space<vmem>>, vector<1x8x256xf32>
    %131 = vector.shape_cast %130 : vector<1x8x256xf32> to vector<8x256xf32>
    %132 = vector.shape_cast %129 : vector<8x256xf32> to vector<1x8x256xf32>
    tpu.vector_store %arg7[%c0_133, %c0_134, %c0_135], %132 {strides = array<i32>} : memref<1x8x256xf32, #tpu.memory_space<vmem>>, vector<1x8x256xf32>,
    return
  }
  func.func @transform_0(%arg0: i32) -> (i32, i32, i32) {
    %c0_i32 = arith.constant 0 : i32
    %c0_i32_0 = arith.constant 0 : i32
    %c0_i32_1 = arith.constant 0 : i32
    return %arg0, %c0_i32, %c0_i32_0 : i32, i32, i32
  }
  func.func @transform_1(%arg0: i32) -> (i32, i32) {
    %c0_i32 = arith.constant 0 : i32
    %c0_i32_0 = arith.constant 0 : i32
    %c0_i32_1 = arith.constant 0 : i32
    return %c0_i32, %c0_i32_0 : i32, i32
  }
  func.func @transform_2(%arg0: i32) -> (i32, i32) {
    %c0_i32 = arith.constant 0 : i32
    %c0_i32_0 = arith.constant 0 : i32
    %c0_i32_1 = arith.constant 0 : i32
    return %c0_i32, %c0_i32_0 : i32, i32
  }
  func.func @transform_3(%arg0: i32) -> (i32, i32) {
    %c0_i32 = arith.constant 0 : i32
    %c0_i32_0 = arith.constant 0 : i32
    %c0_i32_1 = arith.constant 0 : i32
    return %c0_i32, %c0_i32_0 : i32, i32
  }
  func.func @transform_4(%arg0: i32) -> (i32, i32) {
    %c0_i32 = arith.constant 0 : i32
    %c0_i32_0 = arith.constant 0 : i32
    %c0_i32_1 = arith.constant 0 : i32
    return %c0_i32, %c0_i32_0 : i32, i32
  }
  func.func @transform_5(%arg0: i32) -> (i32, i32) {
    %c0_i32 = arith.constant 0 : i32
    %c0_i32_0 = arith.constant 0 : i32
    %c0_i32_1 = arith.constant 0 : i32
    return %c0_i32, %c0_i32_0 : i32, i32
  }
  func.func @transform_6(%arg0: i32) -> (i32, i32, i32) {
    %c0_i32 = arith.constant 0 : i32
    %c0_i32_0 = arith.constant 0 : i32
    %c0_i32_1 = arith.constant 0 : i32
    return %arg0, %c0_i32, %c0_i32_0 : i32, i32, i32
  }
}

</mosaic_0001>

<bundles_post_ra>
// kernel: tpu_custom_call.1
= control target key start
LH: loop header
LB: loop body
LE: loop exit
PB: predicated region body
PF: predicated region fallthrough
CT: control target
= control target key end

     0   :  { %11 = vsyncpa [#allocation5], 0  ;;  %s2078_s0 = inlined_call_operand.hbm [shape: f32[2,8,256], index: 0, kind: input, shape index: {}]   ;;  %s2079_s1 = inlined_call_operand.hbm [shape: f32[9,256], index: 1, kind: input, shape index: {}]   ;;  %s2080_s2 = inlined_call_operand.vmem [shape: f32[8,72], index: 2, kind: input, shape index: {}]   ;;  %s2081_s3 = inlined_call_operand.vmem [shape: f32[8,1], index: 3, kind: input, shape index: {}]   ;;  %s2082_s4 = inlined_call_operand.vmem [shape: f32[8,72], index: 4, kind: input, shape index: {}]   ;;  %s2083_s5 = inlined_call_operand.vmem [shape: f32[8,1], index: 5, kind: input, shape index: {}]   ;;  %s2084_s6 = inlined_call_operand.hbm [shape: f32[2,8,256], index: 6, kind: output, shape index: {}]  }
   0x1   :  { %13 = vsyncpa [#allocation5 + $0x1], 0 }
   0x2   :  { %14 = vsyncpa [#allocation8], 0 }
   0x3   :  { %15 = vsyncpa [#allocation6], 0 }
   0x4   :  { %17 = vsyncpa [#allocation6 + $0x1], 0  ;;  %s1647_s21 = smov 0   ;;  %s1649_s22 = smov 0  }
   0x5   :  { %s1651_s23 = smov 0   ;;  %s1653_s24 = smov 0  }
   0x6 LB: > { %s1668_s25 = sadd.s32 4294967295, %s1587_s24   ;;  %s1258_s26 = sadd.s32 4294967294, %s1587_s24   ;;  %s1587_s24 = sphi %s1653_s24, %s2124_s24   ;;  %s1583_s23 = sphi %s1651_s23, %s2123_s23   ;;  %s1579_s22 = sphi %s1649_s22, %s2122_s22   ;;  %s1575_s21 = sphi %s1647_s21, %s2121_s21  }
   0x7   : > { %p43_p0 = scmp.ne.s32.totalorder %s1579_s22, %s1575_s21  ;;  %p2085_p1 = scmp.eq.s32.totalorder %s1668_s25, 0 }
   0x8   : > { %p178_p3 = scmp.eq.s32.totalorder %s1258_s26, 1  ;;  %p1259_p5 = scmp.ge.s32.totalorder %s1587_s24, 1 }
   0x9   : > { %p1677_p4 = por %p2085_p1, %p43_p0  ;;  %p185_p7 = scmp.lt.s32.totalorder %s1587_s24, 3 }
   0xa   : > { %p1682_p6 = por %p178_p3, %p43_p0  ;;  %s1589_s30 = smov [#allocation7]  }
   0xb   : > { %s2099_s27 = scalar_select %p1677_p4, 1, 0 }
   0xc   : > { %s2100_s28 = scalar_select %p1682_p6, 1, 0 }
   0xd   : > { %p1687_p8 = pnand %p1259_p5, %p185_p7  ;;  %s197_s7 = sshll.u32 %s1589_s30, 4  ;;  %s1691_s7 = int_to_ptr.vmem [resolvable:$true] %s197_s7 }
   0xe   : > { %s1703_s9 = sadd.s32 1, %s1587_s24   ;;  %s30_s10 = sadd.s32 1, %s1583_s23 }
   0xf   : > { %s2101_s29 = scalar_select %p1687_p8, 1, 0 }
  0x10   : > { %p1318_p9 = pneg %p1687_p8  ;;  %s27_s11 = ssub.s32 %s1587_s24, %s1703_s9 }
  0x11   : > { %s1459_s14 = scalar_lea.hbm %s2079_s1, 512 }
  0x12   : > { %p1698_p11 = pnand %p1318_p9, %p2085_p1  ;;  %p1460_p12 = scmp.ne.s32.totalorder %s2079_s1, %s1459_s14 }
  0x13   : > { %p1466_p5 = scmp.lt.u32.totalorder %s1459_s14, %s2079_s1 }
  0x14   : > { %p1461_p13 = pneg %p1698_p11 }
  0x16   : > { %p1462_p0 = pnand %p1461_p13, %p1460_p12 }
  0x18   : > { %p1463_p3 = pneg %p1462_p0 }
  0x1a   : > { %p1468_p7 = pnand %p1466_p5, %p1463_p3 }
  0x1c   : > { %1471 = shalt.err (!%p1468_p7)
}
  0x1d   : > { %s1472_s19 = scalar_lea.vmem %s1691_s7, 512  ;;  %p1480_p2 = scmp.lt.s32.totalorder %s1691_s7, %s1691_s7 }
  0x1e   : > { %p1473_p9 = scmp.ne.s32.totalorder %s1691_s7, %s1472_s19  ;;  %p1481_p6 = scmp.lt.s32.totalorder %s1472_s19, %s1472_s19 }
  0x20   : > { %p1475_p10 = pnand %p1473_p9, %p1461_p13  ;;  %p1482_p4 = por %p1481_p6, %p1480_p2 }
  0x22   : > { %p1476_p1 = pneg %p1475_p10 }
  0x24   : > { %p1483_p8 = pnand %p1482_p4, %p1476_p1 }
  0x26   : > { %1486 = shalt.err (!%p1483_p8)
}
  0x27   : > { %s1590_s20 = smov 256   ;;  %s1591_s26 = smov 16  }
  0x28   : > { %1321 = dma.hbm_to_vmem [thread:$0]  (!%p1698_p11), %s2079_s1, 512, %s1691_s7, [#allocation8], %s1590_s20, %s1590_s20, %s1591_s26  }
  0x29   : > { %p28_p2 = scmp.eq.s32.totalorder %s27_s11, 0  ;;  %p37_p1 = scmp.ne.s32.totalorder %s1583_s23, %s1579_s22 }
  0x2a   : > { %p38_p4 = scmp.eq.s32.totalorder %s1587_s24, 0  ;;  %p1331_p6 = scmp.lt.s32.totalorder %s1587_s24, 2 }
  0x2b   : > { %s1734_s13 = scalar_select %p28_p2, %s1583_s23, %s30_s10  }
  0x2c   : > { %p39_p8 = por %p38_p4, %p37_p1  ;;  %p2103_p10 = scmp.eq.s32.totalorder %s1668_s25, 1 }
  0x2d   : > { %s223_s15 = sand.u32 1, %s1583_s23   ;;  %s1276_s16 = sshll.u32 %s1587_s24, 8 }
  0x2e   : > { %p1738_p12 = por %p2103_p10, %p37_p1  ;;  %s1262_s17 = sshll.u32 %s223_s15, 4 }
  0x2f   : > { %s1747_s19 = scalar_lea.hbm %s2078_s0, %s1276_s16  ;;  %s227_s7 = scalar_lea.vmem [#allocation4], %s1262_s17 }
  0x30   : > { %s235_s10 = sshll.u32 %s227_s7, 4  ;;  %p1749_p11 = pnand %p1331_p6, %p39_p8  ;;  %s1753_s10 = int_to_ptr.vmem [resolvable:$true] %s235_s10 }
  0x31   : > { %s224_s20 = scalar_lea.sflag [#allocation5], %s223_s15  ;;  %s1487_s26 = scalar_lea.hbm %s1747_s19, 256 }
  0x32   : > { %p1488_p13 = scmp.ne.s32.totalorder %s1747_s19, %s1487_s26  ;;  %p1489_p0 = pneg %p1749_p11 }
  0x33   : > { %s1492_s16 = scalar_lea.hbm %s2078_s0, 512  ;;  %p1493_p7 = scmp.lt.u32.totalorder %s1747_s19, %s2078_s0 }
  0x34   : > { %p1490_p3 = pnand %p1489_p0, %p1488_p13  ;;  %p1494_p9 = scmp.lt.u32.totalorder %s1492_s16, %s1487_s26 }
  0x35   : > { %p1496_p1 = scmp.lt.u32.totalorder %s1487_s26, %s1747_s19 }
  0x36   : > { %p1491_p5 = pneg %p1490_p3  ;;  %p1495_p2 = por %p1494_p9, %p1493_p7 }
  0x38   : > { %p1497_p4 = por %p1496_p1, %p1495_p2 }
  0x3a   : > { %p1498_p6 = pnand %p1497_p4, %p1491_p5 }
  0x3c   : > { %1501 = shalt.err (!%p1498_p6)
}
  0x3d   : > { %s1502_s15 = scalar_lea.vmem %s1753_s10, 256  ;;  %s1592_s18 = smov [#allocation4]  }
  0x3e   : > { %p1503_p8 = scmp.ne.s32.totalorder %s1753_s10, %s1502_s15  ;;  %s1507_s7 = sshll.u32 %s1592_s18, 4  ;;  %s1508_s7 = int_to_ptr.vmem [resolvable:$false] %s1507_s7 }
  0x3f   : > { %s1509_s30 = scalar_lea.vmem %s1508_s7, 512  ;;  %p1510_p3 = scmp.lt.s32.totalorder %s1753_s10, %s1508_s7 }
  0x40   : > { %p1505_p10 = pnand %p1503_p8, %p1489_p0  ;;  %p1511_p7 = scmp.lt.s32.totalorder %s1509_s30, %s1502_s15 }
  0x42   : > { %p1506_p13 = pneg %p1505_p10  ;;  %p1512_p9 = por %p1511_p7, %p1510_p3 }
  0x44   : > { %p1513_p2 = pnand %p1512_p9, %p1506_p13 }
  0x46   : > { %1516 = shalt.err (!%p1513_p2)
}
  0x47   : > { %1325 = dma.hbm_to_vmem [thread:$0]  (!%p1749_p11), %s1747_s19, 256, %s1753_s10, %s224_s20  }
  0x48   : > { %p2106_p5 = scmp.ne.s32.totalorder %s2101_s29, 0 }
  0x49   : > { %s1783_s26 = sand.u32 (!%p2106_p5), 1, %s1579_s22   ;;  %p2107_p0 = scmp.ne.s32.totalorder (!%p2106_p5), %s2099_s27, 0 }
  0x4a   : > { %244 = sbr.rel (%p2106_p5) target bundleno = 1086 (0x43e), region = 44  ;;  %s2088_s12 = sshll.u32 (!%p2106_p5), %s1783_s26, 4 }
  0x4b   : > { %s247_s16 = scalar_lea.sflag (!%p2106_p5), [#allocation5], %s1783_s26  ;;  %s250_s17 = scalar_lea.vmem (!%p2106_p5), [#allocation4], %s2088_s12 }
  0x51   : > { %1562 = dma.done.wait (%p2107_p0), %s247_s16, 256  }
  0x52   : > { %1564 = vsyncadd (%p2107_p0), %s247_s16, 4294967040  ;;  %p2108_p11 = scmp.eq.s32.totalorder %s1668_s25, 0 }
  0x54   : > { %1566 = dma.done.wait (%p2108_p11), [#allocation8], 512   ;;  %p2109_p1 = pmov %p2108_p11 }
  0x55   : > { %v307_v0 = vlaneseq  ;;  %vm283_vm0 = vcmask 138240   ;;  %v1593_v1 = vmov 0.0   ;;  %vm285_vm1 = vcmask 277640   ;;  %v1802_v5 = vld [vmem:[%s250_s17] sm:$0xff]  ;;  %s1594_s27 = smov 17   ;;  %v1807_v8 = vld [vmem:[%s250_s17 + $0x8] sm:$0xff] }
  0x56   : > { %1568 = vsyncadd (%p2109_p1), [#allocation8], 4294966784  ;;  %284 = vst.msk [vmem:[#allocation2] sm:$0xff] %vm283_vm0, %v1593_v1  ;;  %727 = vmatprep.mubr.f32.mxu0 %v1593_v1  ;;  %1150 = vmatprep.mubr.f32.mxu1 %v1593_v1  ;;  %v325_v6 = vld [vmem:[#allocation7 + $0x1] ss:$8 sm:$0x3] }
  0x57   : > { %v308_v2 = vshrl.u32 %v307_v0, 7  ;;  %286 = vst.msk [vmem:[#allocation2 + $0x10] sm:$0xff] %vm285_vm1, %v1593_v1  ;;  %291 = vrot.lane.b32.xlu0 %v1802_v5, %s1594_s27  ;;  %v367_v9 = vld [vmem:[#allocation7 + $0x2] ss:$8 sm:$0x3]  ;;  %s1595_s29 = smov 1  }
  0x58   : > { %v409_v12 = vld [vmem:[#allocation7 + $0x3] ss:$8 sm:$0x3]  ;;  %s1596_s19 = smov 2   ;;  %s1597_s10 = smov 16   ;;  %vm299_vm2 = vcmask 1047688  }
  0x59   : > { %v1798_v3 = vsub.s32 0, %v308_v2  ;;  %v1800_v4 = vsub.s32 1, %v308_v2  ;;  %v470_v15 = vld [vmem:[#allocation7 + $0x5] ss:$8 sm:$0x3]  ;;  %s1598_s11 = smov 18  }
  0x5a   : > { %v512_v18 = vld [vmem:[#allocation7 + $0x6] ss:$8 sm:$0x3]  ;;  %v554_v21 = vld [vmem:[#allocation7 + $0x7] ss:$8 sm:$0x3] }
  0x5b   : > { %v330_v7 = vrot.slane %v325_v6, %v1798_v3  ;;  %v334_v10 = vrot.slane %v325_v6, %v1800_v4  ;;  %293 = vrot.lane.b32.xlu0 %v1807_v8, %s1594_s27  ;;  %v372_v11 = vrot.slane %v367_v9, %v1798_v3  ;;  %v376_v13 = vrot.slane %v367_v9, %v1800_v4  ;;  %s1599_s20 = smov 32   ;;  %v596_v24 = vld [vmem:[#allocation7 + $0x10] ss:$8 sm:$0x3]  ;;  %s1600_s8 = smov 33  }
  0x5c   : > { %v414_v14 = vrot.slane %v409_v12, %v1798_v3  ;;  %v418_v16 = vrot.slane %v409_v12, %v1800_v4  ;;  %v475_v17 = vrot.slane %v470_v15, %v1798_v3  ;;  %v479_v19 = vrot.slane %v470_v15, %v1800_v4  ;;  %s1601_s15 = smov 34   ;;  %s1602_s18 = smov 111  }
  0x5d   : > { %335 = vrot.lane.b32.xlu1 %v330_v7, %s1595_s29  ;;  %v517_v20 = vrot.slane %v512_v18, %v1798_v3  ;;  %v521_v22 = vrot.slane %v512_v18, %v1800_v4  ;;  %v559_v23 = vrot.slane %v554_v21, %v1798_v3  ;;  %v563_v25 = vrot.slane %v554_v21, %v1800_v4  ;;  %s2095_s7 = smov 127   ;;  %s2089_s30 = smov 112  }
  0x5e   : > { %v601_v26 = vrot.slane %v596_v24, %v1798_v3  ;;  %v605_v27 = vrot.slane %v596_v24, %v1800_v4  ;;  %vm423_vm3 = vcmask 130048   ;;  %vm339_vm4 = vcmask 7168   ;;  %s2091_s16 = smov 110   ;;  %s2093_s17 = smov 126  }
  0x5f   : > { %377 = vrot.lane.b32.xlu0 %v372_v11, %s1596_s19  ;;  %vm381_vm5 = vcmask 15360   ;;  %vm484_vm6 = vcmask 146432   ;;  %vm526_vm7 = vcmask 261120   ;;  %vm568_vm8 = vcmask 269312   ;;  %s1607_s12 = smov 96  }
  0x60   : > { %vm610_vm9 = vcmask 277504   ;;  %vm356_vm10 = vcmask 1039360   ;;  %vm440_vm11 = vcmask 916480   ;;  %vm2097_vm12 = vcmask 1031168  }
  0x61   : > { %337 = vrot.lane.b32.xlu1 %v334_v10, %s1595_s29  ;;  %vm2098_vm13 = vcmask 900096   ;;  %vm459_vm14 = vcmask 908288   ;;  %vm543_vm15 = vcmask 785408   ;;  %vm585_vm1 = vcmask 777216  }
  0x63   : > { %419 = vrot.lane.b32.xlu0 %v414_v14, %s1597_s10 }
  0x65   : > { %379 = vrot.lane.b32.xlu1 %v376_v13, %s1596_s19 }
  0x67   : > { %480 = vrot.lane.b32.xlu0 %v475_v17, %s1598_s11 }
  0x69   : > { %421 = vrot.lane.b32.xlu1 %v418_v16, %s1597_s10 }
  0x6b   : > { %522 = vrot.lane.b32.xlu0 %v517_v20, %s1599_s20 }
  0x6d   : > { %482 = vrot.lane.b32.xlu1 %v479_v19, %s1598_s11  ;;  %v1609_v19 = vmov 0  }
  0x6e   : > { %1422 = vset.pattern.permute.xlu1 %v1609_v19  ;;  %1458 = vset.pattern.permute.xlu0 %v1609_v19 }
  0x6f   : > { %564 = vrot.lane.b32.xlu0 %v559_v23, %s1600_s8 }
  0x71   : > { %524 = vrot.lane.b32.xlu1 %v521_v22, %s1599_s20  ;;  %v653_v22 = vld [vmem:[%s2081_s3] sm:$0xff] }
  0x73   : > { %606 = vrot.lane.b32.xlu0 %v601_v26, %s1601_s15 }
  0x75   : > { %566 = vrot.lane.b32.xlu1 %v563_v25, %s1600_s8 }
  0x79   : > { %608 = vrot.lane.b32.xlu1 %v605_v27, %s1601_s15 }
  0xc9   : > { %v292_v28 = vpop.permute.xlu0 %291 }
  0xca   : > { %300 = vst.msk [vmem:[#allocation2] sm:$0xff] %vm299_vm2, %v292_v28 }
  0xcd   : > { %v294_v30 = vpop.permute.xlu0 %293 }
  0xce   : > { %302 = vst.msk [vmem:[#allocation2 + $0x10] sm:$0xff] %vm283_vm0, %v294_v30  ;;  %v1847_v36 = vsel %vm283_vm0, %v292_v28, %v294_v30  ;;  %v305_v28 = vld [vmem:[#allocation7] ss:$8 sm:$0x3] }
  0xcf   : > { %v336_v29 = vpop.permute.xlu1 %335 }
  0xd1   : > { %v1840_v32 = vld [vmem:[#allocation2] sm:$0xff]  ;;  %v378_v33 = vpop.permute.xlu0 %377 }
  0xd2   : > { %v344_v34 = vmul.f32 %v336_v29, %v1840_v32  ;;  %453 = vrot.lane.b32.xlu0 %v1840_v32, %s1602_s18  ;;  %v386_v49 = vmul.f32 %v378_v33, %v1840_v32 }
  0xd3   : > { %v338_v31 = vpop.permute.xlu1 %337 }
  0xd4   : > { %350 = vrot.lane.b32.xlu1 %v344_v34, %s2095_s7  ;;  %v340_v44 = vsel %vm339_vm4, %v336_v29, %v338_v31 }
  0xd5   : > { %v1849_v37 = vld [vmem:[#allocation2 + $0x10] sm:$0xff]  ;;  %v420_v38 = vpop.permute.xlu0 %419  ;;  %v345_v53 = vmul.f32 %v340_v44, %v1847_v36 }
  0xd6   : > { %v428_v39 = vmul.f32 %v420_v38, %v1840_v32  ;;  %v1387_v40 = vpack.i.bf16 %v1849_v37, %v1847_v36  ;;  %v346_v48 = vmul.f32 %v338_v31, %v1849_v37  ;;  %v314_v31 = vrot.slane %v305_v28, %v1800_v4 }
  0xd7   : > { %v380_v35 = vpop.permute.xlu1 %379 }
  0xd8   : > { %434 = vrot.lane.b32.xlu1 %v428_v39, %s2089_s30  ;;  %1388 = vrot.lane.b32.xlu0 %v1387_v40, %s1602_s18  ;;  %v382_v51 = vsel %vm381_vm5, %v378_v33, %v380_v35  ;;  %v1392_v58 = vpack.i.bf16 %v346_v48, %v345_v53  ;;  %v388_v60 = vmul.f32 %v380_v35, %v1849_v37 }
  0xd9   : > { %v481_v43 = vpop.permute.xlu0 %480  ;;  %v387_v59 = vmul.f32 %v382_v51, %v1847_v36  ;;  %v310_v33 = vrot.slane %v305_v28, %v1798_v3  ;;  %v318_v39 = vmul.f32 %v314_v31, %v1847_v36 }
  0xda   : > { %v489_v47 = vmul.f32 %v481_v43, %v1840_v32 }
  0xdb   : > { %v422_v41 = vpop.permute.xlu1 %421  ;;  %v1397_v63 = vpack.i.bf16 %v388_v60, %v387_v59 }
  0xdc   : > { %v424_v42 = vsel %vm423_vm3, %v420_v38, %v422_v41  ;;  %v430_v46 = vmul.f32 %v422_v41, %v1849_v37  ;;  %495 = vrot.lane.b32.xlu1 %v489_v47, %s2091_s16  ;;  %392 = vrot.lane.b32.xlu0 %v386_v49, %s2093_s17 }
  0xdd   : > { %v429_v45 = vmul.f32 %v424_v42, %v1847_v36  ;;  %v523_v54 = vpop.permute.xlu0 %522  ;;  %v317_v42 = vmul.f32 %v1840_v32, %v310_v33 }
  0xde   : > { %v531_v10 = vmul.f32 %v523_v54, %v1840_v32 }
  0xdf   : > { %v483_v50 = vpop.permute.xlu1 %482  ;;  %v1402_v55 = vpack.i.bf16 %v430_v46, %v429_v45 }
  0xe0   : > { %v485_v52 = vsel %vm484_vm6, %v481_v43, %v483_v50  ;;  %v491_v57 = vmul.f32 %v483_v50, %v1849_v37  ;;  %1393 = vrot.lane.b32.xlu0 %v1392_v58, %s2095_s7 }
  0xe1   : > { %v490_v56 = vmul.f32 %v485_v52, %v1847_v36  ;;  %1403 = vrot.lane.b32.xlu1 %v1402_v55, %s2089_s30  ;;  %v565_v0 = vpop.permute.xlu0 %564  ;;  %s1608_s30 = smov 95  }
  0xe2   : > { %v573_v16 = vmul.f32 %v565_v0, %v1840_v32 }
  0xe3   : > { %v525_v61 = vpop.permute.xlu1 %524  ;;  %v1407_v62 = vpack.i.bf16 %v491_v57, %v490_v56 }
  0xe4   : > { %v527_v2 = vsel %vm526_vm7, %v523_v54, %v525_v61  ;;  %1398 = vrot.lane.b32.xlu0 %v1397_v63, %s2093_s17  ;;  %v533_v12 = vmul.f32 %v525_v61, %v1849_v37 }
  0xe5   : > { %1408 = vrot.lane.b32.xlu1 %v1407_v62, %s2091_s16  ;;  %v532_v11 = vmul.f32 %v527_v2, %v1847_v36  ;;  %v607_v17 = vpop.permute.xlu0 %606  ;;  %s1610_s16 = smov 94  }
  0xe6   : > { %v615_v23 = vmul.f32 %v607_v17, %v1840_v32 }
  0xe7   : > { %v567_v1 = vpop.permute.xlu1 %566  ;;  %v1412_v15 = vpack.i.bf16 %v533_v12, %v532_v11 }
  0xe8   : > { %v569_v6 = vsel %vm568_vm8, %v565_v0, %v567_v1  ;;  %v575_v7 = vmul.f32 %v567_v1, %v1849_v37  ;;  %537 = vrot.lane.b32.xlu0 %v531_v10, %s1607_s12 }
  0xe9   : > { %v574_v9 = vmul.f32 %v569_v6, %v1847_v36 }
  0xeb   : > { %v1417_v13 = vpack.i.bf16 %v575_v7, %v574_v9  ;;  %v609_v14 = vpop.permute.xlu1 %608 }
  0xec   : > { %v611_v18 = vsel %vm610_vm9, %v607_v17, %v609_v14  ;;  %1413 = vrot.lane.b32.xlu0 %v1412_v15, %s1607_s12  ;;  %v617_v21 = vmul.f32 %v609_v14, %v1849_v37 }
  0xed   : > { %1418 = vrot.lane.b32.xlu1 %v1417_v13, %s1608_s30  ;;  %v616_v20 = vmul.f32 %v611_v18, %v1847_v36 }
  0xf0   : > { %623 = vrot.lane.b32.xlu0 %v616_v20, %s1610_s16 }
  0xf1   : > { %579 = vrot.lane.b32.xlu1 %v573_v16, %s1608_s30 }
  0xf4   : > { %621 = vrot.lane.b32.xlu0 %v615_v23, %s1610_s16 }
  0xf5   : > { %625 = vrot.lane.b32.xlu1 %v617_v21, %s1610_s16 }
  0xf9   : > { %656 = vperm.xlu1 %1422, %v653_v22  }
 0x144   : > { %v454_v25 = vpop.permute.xlu0 %453 }
 0x146   : > { %v351_v24 = vpop.permute.xlu1 %350 }
 0x14a   : > { %v435_v26 = vpop.permute.xlu1 %434  ;;  %v1389_v27 = vpop.permute.xlu0 %1388 }
 0x14b   : > { %v1391_v51 = vunpack.i.h.bf16 %v1389_v27  ;;  %v1390_v52 = vunpack.i.l.bf16 %v1389_v27 }
 0x14d   : > { %v461_v62 = vsel %vm459_vm14, %v1390_v52, %v1391_v51  ;;  %v460_v9 = vsel %vm459_vm14, %v454_v25, %v1390_v52  ;;  %v770_v25 = vld [vmem:[#allocation7 + $0x1] ss:$8 sm:$0x3]  ;;  %v1022_v52 = vld [vmem:[#allocation7 + $0x10] ss:$8 sm:$0x3] }
 0x14e   : > { %v496_v29 = vpop.permute.xlu1 %495  ;;  %v393_v30 = vpop.permute.xlu0 %392  ;;  %v779_v27 = vrot.slane %v770_v25, %v1800_v4 }
 0x150   : > { %782 = vrot.lane.b32.xlu1 %v779_v27, %s1595_s29 }
 0x152   : > { %v1394_v35 = vpop.permute.xlu0 %1393 }
 0x153   : > { %v1404_v34 = vpop.permute.xlu1 %1403  ;;  %v1396_v37 = vunpack.i.h.bf16 %v1394_v35  ;;  %v1395_v38 = vunpack.i.l.bf16 %v1394_v35 }
 0x154   : > { %v1406_v40 = vunpack.i.h.bf16 %v1404_v34  ;;  %v1405_v41 = vunpack.i.l.bf16 %v1404_v34  ;;  %v809_v34 = vld [vmem:[#allocation7 + $0x2] ss:$8 sm:$0x3] }
 0x155   : > { %v358_v44 = vsel %vm356_vm10, %v1395_v38, %v1396_v37  ;;  %v357_v45 = vsel %vm356_vm10, %v351_v24, %v1395_v38  ;;  %v634_v24 = vld [vmem:[%s2080_s2] sm:$0xff]  ;;  %v814_v38 = vrot.slane %v809_v34, %v1798_v3 }
 0x156   : > { %v1399_v48 = vpop.permute.xlu0 %1398  ;;  %v1278_v49 = vpack.c.bf16 %v358_v44, %v318_v39  ;;  %v1280_v50 = vpack.c.bf16 %v357_v45, %v317_v42  ;;  %v442_v32 = vsel %vm440_vm11, %v1405_v41, %v1406_v40  ;;  %v441_v56 = vsel %vm440_vm11, %v435_v26, %v1405_v41  ;;  %v848_v40 = vld [vmem:[#allocation7 + $0x3] ss:$8 sm:$0x3] }
 0x157   : > { %v1409_v43 = vpop.permute.xlu1 %1408  ;;  %v1401_v36 = vunpack.i.h.bf16 %v1399_v48  ;;  %v1400_v53 = vunpack.i.l.bf16 %v1399_v48  ;;  %v775_v26 = vrot.slane %v770_v25, %v1798_v3  ;;  %v818_v39 = vrot.slane %v809_v34, %v1800_v4 }
 0x158   : > { %v1411_v46 = vunpack.i.h.bf16 %v1409_v43  ;;  %v1410_v47 = vunpack.i.l.bf16 %v1409_v43  ;;  %1279 = vmatprep.subr.bf16.mxu0 %v1278_v49  ;;  %v853_v41 = vrot.slane %v848_v40, %v1798_v3  ;;  %v857_v42 = vrot.slane %v848_v40, %v1800_v4  ;;  %v905_v43 = vld [vmem:[#allocation7 + $0x5] ss:$8 sm:$0x3]  ;;  %v983_v49 = vld [vmem:[#allocation7 + $0x7] ss:$8 sm:$0x3] }
 0x159   : > { %1281 = vmatpush1.bf16.msra.mxu0 %v1280_v50  ;;  %v400_v54 = vsel %vm2097_vm12, %v1400_v53, %v1401_v36  ;;  %v399_v55 = vsel %vm2097_vm12, %v393_v30, %v1400_v53  ;;  %vm627_vm12 = vcmask 769024   ;;  %780 = vrot.lane.b32.xlu0 %v775_v26, %s1595_s29  ;;  %v910_v44 = vrot.slane %v905_v43, %v1798_v3  ;;  %s2111_s29 = smov 126  }
 0x15a   : > { %v503_v57 = vsel %vm2098_vm13, %v1410_v47, %v1411_v46  ;;  %v538_v58 = vpop.permute.xlu0 %537  ;;  %v1282_v60 = vpack.c.bf16 %v442_v32, %v400_v54  ;;  %v1284_v61 = vpack.c.bf16 %v441_v56, %v399_v55  ;;  %v502_v0 = vsel %vm2098_vm13, %v496_v29, %v1410_v47  ;;  %v944_v46 = vld [vmem:[#allocation7 + $0x6] ss:$8 sm:$0x3] }
 0x15b   : > { %v1286_v63 = vpack.c.bf16 %v503_v57, %v461_v62  ;;  %v1288_v13 = vpack.c.bf16 %v502_v0, %v460_v9  ;;  %vm659_vm13 = vcmask 588800   ;;  %v914_v45 = vrot.slane %v905_v43, %v1800_v4 }
 0x15c   : > { %1283 = vmatprep.subr.bf16.mxu0 %v1282_v60  ;;  %v949_v47 = vrot.slane %v944_v46, %v1798_v3  ;;  %v953_v48 = vrot.slane %v944_v46, %v1800_v4  ;;  %v988_v50 = vrot.slane %v983_v49, %v1798_v3  ;;  %v992_v51 = vrot.slane %v983_v49, %v1800_v4  ;;  %v1077_v49 = vld [vmem:[%s2083_s5] sm:$0xff] }
 0x15d   : > { %1285 = vmatpush1.bf16.msra.mxu0 %v1284_v61  ;;  %v1027_v36 = vrot.slane %v1022_v52, %v1798_v3  ;;  %v1031_v53 = vrot.slane %v1022_v52, %v1800_v4 }
 0x15e   : > { %v1414_v6 = vpop.permute.xlu0 %1413  ;;  %1287 = vmatprep.subr.bf16.mxu0 %v1286_v63 }
 0x15f   : > { %v1419_v59 = vpop.permute.xlu1 %1418  ;;  %v1416_v10 = vunpack.i.h.bf16 %v1414_v6  ;;  %v1415_v11 = vunpack.i.l.bf16 %v1414_v6 }
 0x160   : > { %v1421_v1 = vunpack.i.h.bf16 %v1419_v59  ;;  %v1420_v2 = vunpack.i.l.bf16 %v1419_v59 }
 0x161   : > { %v544_v14 = vsel %vm543_vm15, %v538_v58, %v1415_v11  ;;  %1289 = vmatpush1.bf16.msra.mxu0 %v1288_v13  ;;  %v545_v15 = vsel %vm543_vm15, %v1415_v11, %v1416_v10 }
 0x162   : > { %v587_v16 = vsel %vm585_vm1, %v1420_v2, %v1421_v1  ;;  %v624_v18 = vpop.permute.xlu0 %623 }
 0x163   : > { %v580_v7 = vpop.permute.xlu1 %579  ;;  %v1290_v20 = vpack.c.bf16 %v587_v16, %v545_v15 }
 0x164   : > { %v586_v12 = vsel %vm585_vm1, %v580_v7, %v1420_v2 }
 0x165   : > { %v1292_v17 = vpack.c.bf16 %v586_v12, %v544_v14  ;;  %1291 = vmatprep.subr.bf16.mxu0 %v1290_v20 }
 0x166   : > { %v622_v22 = vpop.permute.xlu0 %621 }
 0x167   : > { %v626_v19 = vpop.permute.xlu1 %625  ;;  %1293 = vmatpush1.bf16.msra.mxu0 %v1292_v17  ;;  %v628_v23 = vsel %vm627_vm12, %v622_v22, %v624_v18 }
 0x168   : > { %v629_v21 = vsel %vm627_vm12, %v624_v18, %v626_v19 }
 0x169   : > { %679 = vmatprep.subr.mxu0 %v629_v21 }
 0x16b   : > { %680 = vmatpush1.msra.mxu0 %v628_v23 }
 0x16c   : > { %1269 = vmatmul.mubr.msk.f32.vlgmr.msra.gmra.mrb[0].mxu0 %vm659_vm13, %v634_v24 }
 0x178   : > { %v657_v28 = vpop.permute.xlu1 %656 }
 0x1c2   : > { %v783_v54 = vpop.permute.xlu1 %782 }
 0x1cb   : > { %v781_v32 = vpop.permute.xlu0 %780 }
 0x1cc   : > { %v784_v12 = vsel %vm339_vm4, %v781_v32, %v783_v54 }
 0x23f   : > { %v729_v29 = vpop.f32.mrb[0].mxu0 }
 0x240   : > { %v730_v30 = vadd.f32 %v729_v29, %v657_v28  ;;  %v731_v31 = vpop.f32.mrb[1].mxu0 }
 0x241   : > { %v732_v33 = vadd.f32 %v731_v31, %v657_v28 }
 0x242   : > { %v734_v35 = vmax.f32 %v730_v30, 0.0 }
 0x243   : > { %v735_v37 = vmax.f32 %v732_v33, 0.0 }
 0x244   : > { %738 = vrot.lane.b32.xlu0 %v734_v35, %s1594_s27 }
 0x245   : > { %740 = vrot.lane.b32.xlu1 %v735_v37, %s1594_s27  ;;  %s2110_s27 = smov 127  }
 0x248   : > { %819 = vrot.lane.b32.xlu0 %v814_v38, %s1596_s19 }
 0x249   : > { %821 = vrot.lane.b32.xlu1 %v818_v39, %s1596_s19  ;;  %s2112_s19 = smov 112  }
 0x24c   : > { %858 = vrot.lane.b32.xlu0 %v853_v41, %s1597_s10 }
 0x24d   : > { %860 = vrot.lane.b32.xlu1 %v857_v42, %s1597_s10  ;;  %s2113_s10 = smov 110  }
 0x250   : > { %915 = vrot.lane.b32.xlu0 %v910_v44, %s1598_s11 }
 0x251   : > { %917 = vrot.lane.b32.xlu1 %v914_v45, %s1598_s11 }
 0x254   : > { %954 = vrot.lane.b32.xlu0 %v949_v47, %s1599_s20 }
 0x255   : > { %956 = vrot.lane.b32.xlu1 %v953_v48, %s1599_s20 }
 0x258   : > { %993 = vrot.lane.b32.xlu0 %v988_v50, %s1600_s8 }
 0x259   : > { %995 = vrot.lane.b32.xlu1 %v992_v51, %s1600_s8 }
 0x25c   : > { %1032 = vrot.lane.b32.xlu0 %v1027_v36, %s1601_s15 }
 0x25d   : > { %1034 = vrot.lane.b32.xlu1 %v1031_v53, %s1601_s15  ;;  %v751_v53 = vld [vmem:[#allocation7] ss:$8 sm:$0x3]  ;;  %s1277_s15 = sshll.u32 %s1668_s25, 8  ;;  %s1164_s25 = scalar_lea.sflag [#allocation6], %s1783_s26 }
 0x2b6   : > { %v739_v55 = vpop.permute.xlu0 %738 }
 0x2b7   : > { %746 = vst.msk [vmem:[#allocation2] sm:$0xff] %vm299_vm2, %v739_v55  ;;  %v741_v56 = vpop.permute.xlu1 %740 }
 0x2b8   : > { %v1954_v57 = vsel %vm283_vm0, %v739_v55, %v741_v56  ;;  %748 = vst.msk [vmem:[#allocation2 + $0x10] sm:$0xff] %vm283_vm0, %v741_v56  ;;  %v760_v55 = vrot.slane %v751_v53, %v1800_v4  ;;  %v756_v56 = vrot.slane %v751_v53, %v1798_v3  ;;  %vm2114_vm0 = vcmask 1031168  }
 0x2b9   : > { %v789_v18 = vmul.f32 %v784_v12, %v1954_v57  ;;  %vm2115_vm2 = vmmov %vm2114_vm0 }
 0x2ba   : > { %v820_v58 = vpop.permute.xlu0 %819 }
 0x2bb   : > { %v822_v59 = vpop.permute.xlu1 %821 }
 0x2bc   : > { %v823_v19 = vsel %vm381_vm5, %v820_v58, %v822_v59 }
 0x2bd   : > { %v828_v24 = vmul.f32 %v823_v19, %v1954_v57 }
 0x2be   : > { %v1957_v60 = vld [vmem:[#allocation2] sm:$0xff]  ;;  %v859_v61 = vpop.permute.xlu0 %858 }
 0x2bf   : > { %v861_v62 = vpop.permute.xlu1 %860  ;;  %890 = vrot.lane.b32.xlu0 %v1957_v60, %s1602_s18  ;;  %v788_v63 = vmul.f32 %v1957_v60, %v781_v32  ;;  %v827_v0 = vmul.f32 %v820_v58, %v1957_v60  ;;  %v808_v1 = vld [vmem:[#allocation2 + $0x10] sm:$0xff]  ;;  %v866_v6 = vmul.f32 %v859_v61, %v1957_v60 }
 0x2c0   : > { %v862_v9 = vsel %vm423_vm3, %v859_v61, %v861_v62  ;;  %v1423_v10 = vpack.i.bf16 %v808_v1, %v1954_v57  ;;  %v790_v11 = vmul.f32 %v808_v1, %v783_v54  ;;  %v868_v15 = vmul.f32 %v861_v62, %v808_v1 }
 0x2c1   : > { %794 = vrot.lane.b32.xlu1 %v788_v63, %s2110_s27  ;;  %v867_v14 = vmul.f32 %v862_v9, %v1954_v57  ;;  %v829_v21 = vmul.f32 %v822_v59, %v808_v1  ;;  %v764_v63 = vmul.f32 %v760_v55, %v1954_v57  ;;  %vm2116_vm3 = vcmask 900096  }
 0x2c2   : > { %v916_v2 = vpop.permute.xlu0 %915  ;;  %v1428_v22 = vpack.i.bf16 %v790_v11, %v789_v18  ;;  %vm2117_vm4 = vmmov %vm2116_vm3 }
 0x2c3   : > { %v918_v7 = vpop.permute.xlu1 %917  ;;  %833 = vrot.lane.b32.xlu0 %v827_v0, %s2111_s29  ;;  %v923_v16 = vmul.f32 %v916_v2, %v1957_v60  ;;  %v1438_v25 = vpack.i.bf16 %v868_v15, %v867_v14  ;;  %v1433_v30 = vpack.i.bf16 %v829_v21, %v828_v24  ;;  %v763_v0 = vmul.f32 %v1957_v60, %v756_v56 }
 0x2c4   : > { %v919_v20 = vsel %vm484_vm6, %v916_v2, %v918_v7  ;;  %v925_v27 = vmul.f32 %v918_v7, %v808_v1 }
 0x2c5   : > { %872 = vrot.lane.b32.xlu1 %v866_v6, %s2112_s19  ;;  %v924_v26 = vmul.f32 %v919_v20, %v1954_v57 }
 0x2c6   : > { %v955_v13 = vpop.permute.xlu0 %954 }
 0x2c7   : > { %v957_v17 = vpop.permute.xlu1 %956  ;;  %1424 = vrot.lane.b32.xlu0 %v1423_v10, %s1602_s18  ;;  %v1443_v33 = vpack.i.bf16 %v925_v27, %v924_v26  ;;  %v962_v37 = vmul.f32 %v955_v13, %v1957_v60  ;;  %s2118_s18 = sshll.u32 %s1783_s26, 4 }
 0x2c8   : > { %v958_v31 = vsel %vm526_vm7, %v955_v13, %v957_v17  ;;  %v964_v39 = vmul.f32 %v957_v17, %v808_v1 }
 0x2c9   : > { %929 = vrot.lane.b32.xlu1 %v923_v16, %s2113_s10  ;;  %v963_v38 = vmul.f32 %v958_v31, %v1954_v57 }
 0x2ca   : > { %v994_v23 = vpop.permute.xlu0 %993 }
 0x2cb   : > { %v996_v28 = vpop.permute.xlu1 %995  ;;  %1429 = vrot.lane.b32.xlu0 %v1428_v22, %s2110_s27  ;;  %v1448_v43 = vpack.i.bf16 %v964_v39, %v963_v38  ;;  %v1001_v45 = vmul.f32 %v994_v23, %v1957_v60  ;;  %s2034_s27 = scalar_lea.hbm %s2084_s6, %s1277_s15 }
 0x2cc   : > { %v997_v29 = vsel %vm568_vm8, %v994_v23, %v996_v28  ;;  %v1003_v35 = vmul.f32 %v996_v28, %v808_v1 }
 0x2cd   : > { %1439 = vrot.lane.b32.xlu1 %v1438_v25, %s2112_s19  ;;  %v1002_v34 = vmul.f32 %v997_v29, %v1954_v57  ;;  %s1611_s19 = smov [#allocation9]  }
 0x2ce   : > { %v1033_v41 = vpop.permute.xlu0 %1032 }
 0x2cf   : > { %1434 = vrot.lane.b32.xlu0 %v1433_v30, %s2111_s29  ;;  %v1453_v40 = vpack.i.bf16 %v1003_v35, %v1002_v34  ;;  %v1035_v42 = vpop.permute.xlu1 %1034  ;;  %v1040_v48 = vmul.f32 %v1033_v41, %v1957_v60 }
 0x2d0   : > { %v1036_v44 = vsel %vm610_vm9, %v1033_v41, %v1035_v42  ;;  %v1042_v47 = vmul.f32 %v1035_v42, %v808_v1 }
 0x2d1   : > { %1444 = vrot.lane.b32.xlu1 %v1443_v33, %s2113_s10  ;;  %v1041_v46 = vmul.f32 %v1036_v44, %v1954_v57  ;;  %s1521_s10 = sshll.u32 %s1611_s19, 4  ;;  %s1522_s10 = int_to_ptr.vmem [resolvable:$false] %s1521_s10 }
 0x2d2   : > { %s1523_s11 = scalar_lea.vmem %s1522_s10, 512 }
 0x2d3   : > { %968 = vrot.lane.b32.xlu0 %v962_v37, %s1607_s12 }
 0x2d5   : > { %1454 = vrot.lane.b32.xlu1 %v1453_v40, %s1608_s30 }
 0x2d7   : > { %1449 = vrot.lane.b32.xlu0 %v1448_v43, %s1607_s12 }
 0x2d9   : > { %1007 = vrot.lane.b32.xlu1 %v1001_v45, %s1608_s30  ;;  %s282_s30 = scalar_lea.vmem [#allocation9], %s2118_s18 }
 0x2db   : > { %1048 = vrot.lane.b32.xlu0 %v1041_v46, %s1610_s16 }
 0x2dd   : > { %1050 = vrot.lane.b32.xlu1 %v1042_v47, %s1610_s16 }
 0x2df   : > { %1046 = vrot.lane.b32.xlu0 %v1040_v48, %s1610_s16  ;;  %v1058_v48 = vld [vmem:[%s2082_s4] sm:$0xff]  ;;  %s1178_s16 = sshll.u32 %s282_s30, 4  ;;  %s2036_s16 = int_to_ptr.vmem [resolvable:$true] %s1178_s16 }
 0x2e0   : > { %s1517_s29 = scalar_lea.vmem %s2036_s16, 256  ;;  %p1524_p10 = scmp.lt.s32.totalorder %s2036_s16, %s1522_s10 }
 0x2e1   : > { %1080 = vperm.xlu1 %1422, %v1077_v49   ;;  %p1518_p4 = scmp.ne.s32.totalorder %s2036_s16, %s1517_s29  ;;  %p1525_p13 = scmp.lt.s32.totalorder %s1523_s11, %s1517_s29 }
 0x2e3   : > { %p1519_p6 = pnand %p1518_p4, %p1738_p12  ;;  %p1526_p3 = por %p1525_p13, %p1524_p10 }
 0x2e5   : > { %p1520_p8 = pneg %p1519_p6 }
 0x2e7   : > { %p1527_p7 = pnand %p1526_p3, %p1520_p8 }
 0x331   : > { %v891_v50 = vpop.permute.xlu0 %890 }
 0x333   : > { %v795_v51 = vpop.permute.xlu1 %794 }
 0x335   : > { %v834_v52 = vpop.permute.xlu0 %833 }
 0x337   : > { %v873_v36 = vpop.permute.xlu1 %872 }
 0x339   : > { %v1425_v32 = vpop.permute.xlu0 %1424 }
 0x33a   : > { %v1427_v4 = vunpack.i.h.bf16 %v1425_v32  ;;  %v1426_v12 = vunpack.i.l.bf16 %v1425_v32 }
 0x33b   : > { %v930_v54 = vpop.permute.xlu1 %929 }
 0x33c   : > { %v897_v22 = vsel %vm459_vm14, %v1426_v12, %v1427_v4  ;;  %v896_v30 = vsel %vm459_vm14, %v891_v50, %v1426_v12 }
 0x33d   : > { %v1430_v58 = vpop.permute.xlu0 %1429 }
 0x33e   : > { %v1432_v59 = vunpack.i.h.bf16 %v1430_v58  ;;  %v1431_v61 = vunpack.i.l.bf16 %v1430_v58 }
 0x33f   : > { %v1440_v62 = vpop.permute.xlu1 %1439 }
 0x340   : > { %v1442_v1 = vunpack.i.h.bf16 %v1440_v62  ;;  %v1441_v2 = vunpack.i.l.bf16 %v1440_v62  ;;  %v801_v6 = vsel %vm356_vm10, %v1431_v61, %v1432_v59  ;;  %v800_v7 = vsel %vm356_vm10, %v795_v51, %v1431_v61 }
 0x341   : > { %v1435_v9 = vpop.permute.xlu0 %1434  ;;  %v1294_v10 = vpack.c.bf16 %v801_v6, %v764_v63  ;;  %v1296_v11 = vpack.c.bf16 %v800_v7, %v763_v0 }
 0x342   : > { %v1437_v3 = vunpack.i.h.bf16 %v1435_v9  ;;  %v1436_v13 = vunpack.i.l.bf16 %v1435_v9  ;;  %v879_v15 = vsel %vm440_vm11, %v1441_v2, %v1442_v1  ;;  %v878_v57 = vsel %vm440_vm11, %v873_v36, %v1441_v2 }
 0x343   : > { %v1445_v14 = vpop.permute.xlu1 %1444  ;;  %1295 = vmatprep.subr.bf16.mxu1 %v1294_v10 }
 0x344   : > { %v1447_v60 = vunpack.i.h.bf16 %v1445_v14  ;;  %v1446_v16 = vunpack.i.l.bf16 %v1445_v14  ;;  %1297 = vmatpush1.bf16.msra.mxu1 %v1296_v11  ;;  %v840_v17 = vsel %vm2114_vm0, %v1436_v13, %v1437_v3  ;;  %v839_v18 = vsel %vm2115_vm2, %v834_v52, %v1436_v13 }
 0x345   : > { %v969_v19 = vpop.permute.xlu0 %968  ;;  %v1298_v20 = vpack.c.bf16 %v879_v15, %v840_v17  ;;  %v1300_v21 = vpack.c.bf16 %v878_v57, %v839_v18 }
 0x346   : > { %v936_v23 = vsel %vm2116_vm3, %v1446_v16, %v1447_v60  ;;  %v935_v26 = vsel %vm2117_vm4, %v930_v54, %v1446_v16 }
 0x347   : > { %v1455_v24 = vpop.permute.xlu1 %1454  ;;  %1299 = vmatprep.subr.bf16.mxu1 %v1298_v20  ;;  %v1302_v25 = vpack.c.bf16 %v936_v23, %v897_v22  ;;  %v1304_v34 = vpack.c.bf16 %v935_v26, %v896_v30 }
 0x348   : > { %v1457_v27 = vunpack.i.h.bf16 %v1455_v24  ;;  %v1456_v28 = vunpack.i.l.bf16 %v1455_v24  ;;  %1301 = vmatpush1.bf16.msra.mxu1 %v1300_v21 }
 0x349   : > { %v1450_v29 = vpop.permute.xlu0 %1449  ;;  %1303 = vmatprep.subr.bf16.mxu1 %v1302_v25 }
 0x34a   : > { %v1452_v31 = vunpack.i.h.bf16 %v1450_v29  ;;  %v1451_v33 = vunpack.i.l.bf16 %v1450_v29  ;;  %v1014_v40 = vsel %vm585_vm1, %v1456_v28, %v1457_v27 }
 0x34b   : > { %v1008_v35 = vpop.permute.xlu1 %1007 }
 0x34c   : > { %v974_v37 = vsel %vm543_vm15, %v969_v19, %v1451_v33  ;;  %v1013_v38 = vsel %vm585_vm1, %v1008_v35, %v1456_v28  ;;  %1305 = vmatpush1.bf16.msra.mxu1 %v1304_v34  ;;  %v975_v39 = vsel %vm543_vm15, %v1451_v33, %v1452_v31 }
 0x34d   : > { %v1308_v41 = vpack.c.bf16 %v1013_v38, %v974_v37  ;;  %v1049_v42 = vpop.permute.xlu0 %1048  ;;  %v1306_v43 = vpack.c.bf16 %v1014_v40, %v975_v39 }
 0x34f   : > { %v1051_v44 = vpop.permute.xlu1 %1050  ;;  %1307 = vmatprep.subr.bf16.mxu1 %v1306_v43 }
 0x350   : > { %1309 = vmatpush1.bf16.msra.mxu1 %v1308_v41  ;;  %v1053_v45 = vsel %vm627_vm12, %v1049_v42, %v1051_v44 }
 0x351   : > { %v1047_v46 = vpop.permute.xlu0 %1046  ;;  %1102 = vmatprep.subr.mxu1 %v1053_v45 }
 0x352   : > { %v1052_v47 = vsel %vm627_vm12, %v1047_v46, %v1049_v42 }
 0x354   : > { %1103 = vmatpush1.msra.mxu1 %v1052_v47 }
 0x355   : > { %1270 = vmatmul.mubr.msk.f32.vlgmr.msra.gmra.mrb[0].mxu1 %vm659_vm13, %v1058_v48 }
 0x360   : > { %v1081_v49 = vpop.permute.xlu1 %1080 }
 0x428   : > { %v1152_v50 = vpop.f32.mrb[0].mxu1 }
 0x429   : > { %v1153_v51 = vadd.f32 %v1152_v50, %v1081_v49  ;;  %v1154_v52 = vpop.f32.mrb[1].mxu1 }
 0x42a   : > { %v1155_v36 = vadd.f32 %v1154_v52, %v1081_v49 }
 0x42b   : > { %v1157_v53 = vmax.f32 %v1153_v51, 0.0 }
 0x42c   : > { %v1158_v32 = vmax.f32 %v1155_v36, 0.0 }
 0x42d   : > { %v1159_v54 = vadd.f32 %v1157_v53, %v1802_v5 }
 0x42e   : > { %v1160_v55 = vadd.f32 %v1158_v32, %v1807_v8 }
 0x42f   : > { %1161 = vst [vmem:[%s282_s30] sm:$0xff] %v1159_v54 }
 0x430   : > { %1162 = vst [vmem:[%s282_s30 + $0x8] sm:$0xff] %v1160_v55 }
 0x431   : > { %1530 = shalt.err (!%p1527_p7)
}
 0x432   : > { %s1531_s26 = scalar_lea.hbm %s2034_s27, 256  ;;  %s1535_s8 = scalar_lea.hbm %s2084_s6, 512 }
 0x433   : > { %p1532_p9 = scmp.ne.s32.totalorder %s2034_s27, %s1531_s26  ;;  %p1536_p0 = scmp.lt.u32.totalorder %s2034_s27, %s2084_s6 }
 0x434   : > { %p1537_p11 = scmp.lt.u32.totalorder %s1535_s8, %s1531_s26  ;;  %p1539_p4 = scmp.lt.u32.totalorder %s1531_s26, %s2034_s27 }
 0x435   : > { %p1533_p2 = pnand %p1532_p9, %p1738_p12 }
 0x436   : > { %p1538_p1 = por %p1537_p11, %p1536_p0 }
 0x437   : > { %p1534_p5 = pneg %p1533_p2 }
 0x438   : > { %p1540_p6 = por %p1539_p4, %p1538_p1 }
 0x43a   : > { %p1541_p8 = pnand %p1540_p6, %p1534_p5 }
 0x43c   : > { %1544 = shalt.err (!%p1541_p8)
}
 0x43d   : > { %1316 = dma.vmem_to_hbm [thread:$0]  (%p1738_p12), %s2036_s16, 256, %s2034_s27, %s1164_s25  }
 0x43e PF: > { %s1190_s30 = sand.u32 1, %s1575_s21   ;;  %p2119_p10 = scmp.ne.s32.totalorder %s2100_s28, 0 }
 0x43f   : > { %p2120_p13 = scmp.ge.s32.totalorder %s1587_s24, 2  ;;  %s1191_s7 = scalar_lea.sflag [#allocation6], %s1190_s30 }
 0x441   : > { %p1327_p3 = pnand %p2120_p13, %p2119_p10 }
 0x443   : > { %1570 = dma.done.wait (!%p1327_p3), %s1191_s7, 256  }
 0x444   : > { %1572 = vsyncadd (!%p1327_p3), %s1191_s7, 4294967040  ;;  %p20_p7 = scmp.ge.s32.totalorder %s1703_s9, 4   ;;  %s2121_s21 = smov %s1579_s22 }
 0x445   : > { %s2122_s22 = smov %s1583_s23  ;;  %s2123_s23 = smov %s1734_s13 }
 0x446   : > { %s2124_s24 = smov %s1703_s9  ;;  %22 = sbr.rel (!%p20_p7) target bundleno = 6 (0x6), region = 100 }
 0x44d   :  { %1196 = vsyncpa [#allocation5], 1 }
 0x44e   :  { %1198 = vsyncpa [#allocation5 + $0x1], 1 }
 0x44f   :  { %1199 = vsyncpa [#allocation8], 1 }
 0x450   :  { %1200 = vsyncpa [#allocation6], 1 }
 0x451   :  { %1202 = vsyncpa [#allocation6 + $0x1], 1 }

</bundles_post_ra>
